<compile_context>
chip_gen: v7x
topology: tpu7x:2x2x1
jax: 0.10.0
libtpu: 0.0.40
codegen_flags: <defaults>
</compile_context>

<pallas_src>
import functools

import jax
import jax.numpy as jnp
from jax import lax
from jax.experimental import pallas as pl
from jax.experimental.pallas import tpu as pltpu

_INV_SQRT2 = 0.7071067811865476  # 1/sqrt(2): constant multiply instead of divide


def _round_up(x, m):
    return ((x + m - 1) // m) * m


def _pad_to(x, shape):
    pads = [(0, t - s) for s, t in zip(x.shape, shape)]
    if all(p == (0, 0) for p in pads):
        return x                      # no copy when already aligned
    return jnp.pad(x, pads)


def _default_vmem_limit():
    """~75% of physical VMEM (generation-aware: ~48 MiB v7x, ~96 MiB v5e/v6e)."""
    try:
        cap = int(pltpu.get_tpu_info().vmem_capacity_bytes)
        if cap > 0:
            return (cap * 3) // 4
    except Exception:
        pass
    return None


def _compiler_params(dimension_semantics, vmem_limit_bytes=None):
    kwargs = dict(dimension_semantics=dimension_semantics)
    if vmem_limit_bytes is None:
        vmem_limit_bytes = _default_vmem_limit()
    if vmem_limit_bytes is not None:
        kwargs["vmem_limit_bytes"] = int(vmem_limit_bytes)
    return pltpu.CompilerParams(**kwargs)


def _layernorm_in_kernel(y, g_ref, b_ref, hidden, eps):
    """LayerNorm over the first `hidden` lanes of y ([rows, Hp], f32)."""
    if y.shape[-1] == hidden:                       # fast path: lane-aligned H
        mean = jnp.mean(y, axis=-1, keepdims=True)
        d = y - mean
        var = jnp.mean(d * d, axis=-1, keepdims=True)
    else:                                           # masked stats over real H
        col = lax.broadcasted_iota(jnp.int32, y.shape, 1)
        valid = (col < hidden).astype(jnp.float32)
        inv_h = 1.0 / hidden
        mean = jnp.sum(y * valid, axis=-1, keepdims=True) * inv_h
        d = (y - mean) * valid
        var = jnp.sum(d * d, axis=-1, keepdims=True) * inv_h
    return d * lax.rsqrt(var + eps) * g_ref[...].astype(jnp.float32) \
        + b_ref[...].astype(jnp.float32)


# ---------------------------------------------------------------------------
# Attention block: MHSA + output dense + residual + LayerNorm.
# Grid = (batch, query tiles); K/V computed from the full (padded) sequence.
# ---------------------------------------------------------------------------
def _attention_kernel(xq_ref, xkv_ref, mask_ref, wq_ref, wk_ref, wv_ref,
                      wo_ref, bo_ref, g_ref, beta_ref, o_ref, *,
                      num_heads, head_dim, scale, eps, hidden):
    cdt = xq_ref.dtype                      # compute dtype for MXU operands

    x_q = xq_ref[...]                       # [tq, Hp] query rows
    x_kv = xkv_ref[...]                     # [Sp, Hp] full sequence (keys/vals)

    # Additive key-mask bias, computed once per step (hoisted out of head loop).
    bias = jnp.where(mask_ref[...] == 0, -jnp.inf, 0.0).astype(jnp.float32)  # [1, Sp]

    # Full-width projections (MXU fed with N = K = Hp); scale folded into q.
    q = (jnp.dot(x_q, wq_ref[...], preferred_element_type=jnp.float32)
         * scale).astype(cdt)                                            # [tq, Hp]
    k = jnp.dot(x_kv, wk_ref[...],
                preferred_element_type=jnp.float32).astype(cdt)          # [Sp, Hp]
    v = jnp.dot(x_kv, wv_ref[...],
                preferred_element_type=jnp.float32).astype(cdt)          # [Sp, Hp]

    ctx_parts = []
    for h in range(num_heads):              # static unroll; per-head K/N = head_dim
        sl = slice(h * head_dim, (h + 1) * head_dim)
        s = lax.dot_general(q[:, sl], k[:, sl], (((1,), (1,)), ((), ())),
                            preferred_element_type=jnp.float32)          # [tq, Sp]
        s = s + bias                        # masked_fill(mask==0, -inf) equivalent
        m = jnp.max(s, axis=-1, keepdims=True)
        p = jnp.exp(s - m)                  # un-normalized softmax numerator
        l = jnp.sum(p, axis=-1, keepdims=True)
        ctx = jnp.dot(p.astype(cdt), v[:, sl],
                      preferred_element_type=jnp.float32)                # [tq, d]
        # deferred normalization: one [tq,d] multiply + EUP reciprocal
        ctx = ctx * pl.reciprocal(l, approx=False)
        ctx_parts.append(ctx.astype(cdt))

    ctx_all = ctx_parts[0] if num_heads == 1 \
        else jnp.concatenate(ctx_parts, axis=-1)                         # [tq, H]

    # Single full-width output projection over the concatenated heads.
    y = jnp.dot(ctx_all, wo_ref[:hidden, :], preferred_element_type=jnp.float32)
    y = y + bo_ref[...].astype(jnp.float32)
    # TODO(synk): dropout omitted (eval/inference semantics -> identity).
    y = y + x_q.astype(jnp.float32)         # residual with block input

    o_ref[...] = _layernorm_in_kernel(y, g_ref, beta_ref, hidden, eps).astype(o_ref.dtype)


def attention_block(x, mask, wq, wk, wv, wo, bo, gamma, beta, *, num_heads, eps,
                    q_tile=256, vmem_limit_bytes=None):
    """x: [B,S,H]; mask: [B,S]. Returns padded flat activations [B*Sp, Hp]."""
    B, S, H = x.shape
    head_dim = H // num_heads
    scale = float(H) ** -0.5      # module uses input_dim ** -0.5 (not head dim)

    Hp = _round_up(H, 128)                              # lane-dense output store
    Sp = _round_up(S, 8)
    tq = q_tile if Sp >= q_tile else Sp                 # query tile (multiple of 8)
    Sp = _round_up(Sp, tq)
    nq = Sp // tq
    # TODO(synk): when nq > 1 the K/V projections are recomputed per query tile;
    # a flash-style KV-tiled variant would avoid that for very long sequences.

    xp = _pad_to(x, (B, Sp, Hp))
    maskp = _pad_to(mask.reshape(B, 1, S).astype(jnp.int32), (B, 1, Sp))
    wqp = _pad_to(wq, (Hp, Hp))
    wkp = _pad_to(wk, (Hp, Hp))
    wvp = _pad_to(wv, (Hp, Hp))
    wop = _pad_to(wo, (Hp, Hp))
    bop = _pad_to(bo.reshape(1, H), (1, Hp))
    gp = _pad_to(gamma.reshape(1, H), (1, Hp))
    bp = _pad_to(beta.reshape(1, H), (1, Hp))

    kernel = functools.partial(_attention_kernel, num_heads=num_heads,
                               head_dim=head_dim, scale=scale, eps=eps, hidden=H)

    itemsize = jnp.dtype(x.dtype).itemsize
    cost = pl.CostEstimate(
        flops=int(8 * B * S * H * H + 4 * B * S * S * H),
        transcendentals=int(B * num_heads * S * S),
        bytes_accessed=int(itemsize * (2 * B * S * H + 4 * H * H + 4 * H)),
    )

    out = pl.pallas_call(
        kernel,
        out_shape=jax.ShapeDtypeStruct((B * Sp, Hp), x.dtype),
        grid_spec=pltpu.PrefetchScalarGridSpec(
            num_scalar_prefetch=0,
            grid=(B, nq),
            in_specs=[
                pl.BlockSpec((None, tq, Hp), lambda b, qi: (b, qi, 0)),  # x (queries)
                pl.BlockSpec((None, Sp, Hp), lambda b, qi: (b, 0, 0)),   # x (keys/values)
                pl.BlockSpec((None, 1, Sp), lambda b, qi: (b, 0, 0)),    # key mask
                pl.BlockSpec((Hp, Hp), lambda b, qi: (0, 0)),            # Wq
                pl.BlockSpec((Hp, Hp), lambda b, qi: (0, 0)),            # Wk
                pl.BlockSpec((Hp, Hp), lambda b, qi: (0, 0)),            # Wv
                pl.BlockSpec((Hp, Hp), lambda b, qi: (0, 0)),            # Wo
                pl.BlockSpec((1, Hp), lambda b, qi: (0, 0)),             # bo
                pl.BlockSpec((1, Hp), lambda b, qi: (0, 0)),             # LN1 gamma
                pl.BlockSpec((1, Hp), lambda b, qi: (0, 0)),             # LN1 beta
            ],
            out_specs=pl.BlockSpec((tq, Hp), lambda b, qi: (b * nq + qi, 0)),
        ),
        compiler_params=_compiler_params(("parallel", "parallel"), vmem_limit_bytes),
        cost_estimate=cost,
    )(xp, xp, maskp, wqp, wkp, wvp, wop, bop, gp, bp)

    return out, Sp, Hp


# ---------------------------------------------------------------------------
# FFN block: dense1 -> GELU -> dense2, fused with residual + LayerNorm.
# Grid = (token tiles [parallel], intermediate tiles [arbitrary/reduction]).
# ---------------------------------------------------------------------------
def _ffn_ln_kernel(x_ref, w1_ref, b1_ref, w2_ref, b2_ref, g_ref, beta_ref,
                   o_ref, acc_ref, *, hidden, eps):
    k = pl.program_id(1)

    @pl.when(k == 0)
    def _():
        acc_ref[...] = jnp.zeros_like(acc_ref)

    # dense_1 partial over this intermediate tile: native-dtype in, f32 acc.
    h = jnp.dot(x_ref[...], w1_ref[...], preferred_element_type=jnp.float32)
    h = h + b1_ref[...].astype(jnp.float32)
    # exact erf-GELU (matches torch.nn.GELU default)
    h = 0.5 * h * (1.0 + lax.erf(h * _INV_SQRT2))
    # dense_2 partial accumulation (cast h back to the weight dtype for the MXU)
    acc_ref[...] += jnp.dot(h.astype(w2_ref.dtype), w2_ref[...],
                            preferred_element_type=jnp.float32)

    @pl.when(k == pl.num_programs(1) - 1)
    def _():
        y = acc_ref[...] + b2_ref[...].astype(jnp.float32)
        # TODO(synk): dropout omitted (eval/inference semantics -> identity).
        y = y + x_ref[...].astype(jnp.float32)          # residual with att_output
        o_ref[...] = _layernorm_in_kernel(y, g_ref, beta_ref, hidden, eps).astype(o_ref.dtype)


def ffn_layernorm_block(x, w1, b1, w2, b2, gamma, beta, *, eps, hidden=None,
                        row_tile=512, inter_tile=1024, vmem_limit_bytes=None):
    """LayerNorm(x + FFN(x)).  x: [T, Hin] (Hin may already be padded >= hidden)."""
    T, Hin = x.shape
    H = Hin if hidden is None else hidden
    I = w1.shape[1]

    # Lane-dense padding (multiples of 128); zero padding is mathematically exact.
    Hp = _round_up(Hin, 128)
    Ip = _round_up(I, 128)
    ti = min(inter_tile, Ip)          # streamed intermediate tile (multiple of 128)
    Ip = _round_up(Ip, ti)
    # Large token tiles raise arithmetic intensity on the streamed weights.
    tm = row_tile if T >= row_tile else _round_up(T, 8)
    Tp = _round_up(T, tm)

    xp = _pad_to(x, (Tp, Hp))                       # no-op when already aligned
    w1p = _pad_to(w1, (Hp, Ip))
    b1p = _pad_to(b1.reshape(1, I), (1, Ip))
    w2p = _pad_to(w2, (Ip, Hp))
    b2p = _pad_to(b2.reshape(1, H), (1, Hp))
    gp = _pad_to(gamma.reshape(1, H), (1, Hp))
    bp = _pad_to(beta.reshape(1, H), (1, Hp))

    grid = (Tp // tm, Ip // ti)
    kernel = functools.partial(_ffn_ln_kernel, hidden=H, eps=eps)

    itemsize = jnp.dtype(x.dtype).itemsize
    cost = pl.CostEstimate(
        flops=int(4 * T * H * I),
        transcendentals=int(T * I),                  # erf
        bytes_accessed=int(itemsize * (2 * T * H + 2 * H * I + I + 3 * H)),
    )

    out = pl.pallas_call(
        kernel,
        out_shape=jax.ShapeDtypeStruct((Tp, Hp), x.dtype),
        grid_spec=pltpu.PrefetchScalarGridSpec(
            num_scalar_prefetch=0,
            grid=grid,
            in_specs=[
                pl.BlockSpec((tm, Hp), lambda i, k: (i, 0)),   # x tile (reused over k)
                pl.BlockSpec((Hp, ti), lambda i, k: (0, k)),   # w1 tile (streams over k)
                pl.BlockSpec((1, ti), lambda i, k: (0, k)),    # b1 tile
                pl.BlockSpec((ti, Hp), lambda i, k: (k, 0)),   # w2 tile (streams over k)
                pl.BlockSpec((1, Hp), lambda i, k: (0, 0)),    # b2
                pl.BlockSpec((1, Hp), lambda i, k: (0, 0)),    # LN2 gamma
                pl.BlockSpec((1, Hp), lambda i, k: (0, 0)),    # LN2 beta
            ],
            out_specs=pl.BlockSpec((tm, Hp), lambda i, k: (i, 0)),
            scratch_shapes=[pltpu.VMEM((tm, Hp), jnp.float32)],  # f32 accumulator
        ),
        compiler_params=_compiler_params(("parallel", "arbitrary"), vmem_limit_bytes),
        cost_estimate=cost,
    )(xp, w1p, b1p, w2p, b2p, gp, bp)

    return out


# ---------------------------------------------------------------------------
# new_expert forward
# ---------------------------------------------------------------------------
def new_expert_forward(hidden_states, attention_mask, params, *, num_heads, eps):
    B, S, H = hidden_states.shape
    # Attention kernel emits the padded flat [B*Sp, Hp] layout the FFN expects
    # (avoids an HBM re-pad / extra round trip between the two kernels).
    att2d, Sp, Hp = attention_block(hidden_states, attention_mask,
                                    params["wq"], params["wk"], params["wv"],
                                    params["wo"], params["bo"],
                                    params["ln1_g"], params["ln1_b"],
                                    num_heads=num_heads, eps=eps)
    out2d = ffn_layernorm_block(att2d,
                                params["w1"], params["b1"],
                                params["w2"], params["b2"],
                                params["ln2_g"], params["ln2_b"],
                                eps=eps, hidden=H)
    return out2d[:B * Sp, :Hp].reshape(B, Sp, Hp)[:, :S, :H]


# ---------------------------------------------------------------------------
# Pure-JAX reference
# ---------------------------------------------------------------------------
def _layernorm_ref(x, g, b, eps):
    mean = jnp.mean(x, axis=-1, keepdims=True)
    d = x - mean
    var = jnp.mean(d * d, axis=-1, keepdims=True)
    return d * lax.rsqrt(var + eps) * g + b


def _reference(x, attention_mask, params, *, num_heads, eps):
    B, S, H = x.shape
    d = H // num_heads
    scale = float(H) ** -0.5
    x = x.astype(jnp.float32)

    q = (x @ params["wq"]).reshape(B, S, num_heads, d).transpose(0, 2, 1, 3)
    k = (x @ params["wk"]).reshape(B, S, num_heads, d).transpose(0, 2, 1, 3)
    v = (x @ params["wv"]).reshape(B, S, num_heads, d).transpose(0, 2, 1, 3)
    s = jnp.einsum("bhid,bhjd->bhij", q, k) * scale
    s = jnp.where(attention_mask[:, None, None, :] == 0, -jnp.inf, s)
    p = jax.nn.softmax(s, axis=-1)
    ctx = jnp.einsum("bhij,bhjd->bhid", p, v).transpose(0, 2, 1, 3).reshape(B, S, H)

    y = ctx @ params["wo"] + params["bo"]
    att = _layernorm_ref(y + x, params["ln1_g"], params["ln1_b"], eps)

    h = att @ params["w1"] + params["b1"]
    h = 0.5 * h * (1.0 + lax.erf(h * _INV_SQRT2))
    f = h @ params["w2"] + params["b2"]
    return _layernorm_ref(att + f, params["ln2_g"], params["ln2_b"], eps)


if __name__ == "__main__":
    # Small config consistent with the module: hidden=32, heads=2, intermediate=64.
    batch, seq, hidden, intermediate, num_heads = 2, 8, 32, 64, 2
    eps = 1e-12

    key = jax.random.PRNGKey(0)
    ks = jax.random.split(key, 14)

    def w(k, shape, scale=0.02):
        return (scale * jax.random.normal(k, shape)).astype(jnp.float32)

    x = jax.random.normal(ks[0], (batch, seq, hidden), dtype=jnp.float32)
    attention_mask = jnp.ones((batch, seq), dtype=jnp.int32).at[1, -2:].set(0)

    # All linear weights in [in_features, out_features] layout (nn.Linear.weight.T);
    # per-head qkv projections packed head-major along the output axis.
    params = {
        "wq": w(ks[1], (hidden, hidden), 0.1),
        "wk": w(ks[2], (hidden, hidden), 0.1),
        "wv": w(ks[3], (hidden, hidden), 0.1),
        "wo": w(ks[4], (hidden, hidden)),
        "bo": w(ks[5], (hidden,)),
        "ln1_g": 1.0 + w(ks[6], (hidden,), 0.1),
        "ln1_b": w(ks[7], (hidden,)),
        "w1": w(ks[8], (hidden, intermediate)),
        "b1": w(ks[9], (intermediate,)),
        "w2": w(ks[10], (intermediate, hidden)),
        "b2": w(ks[11], (hidden,)),
        "ln2_g": 1.0 + w(ks[12], (hidden,), 0.1),
        "ln2_b": w(ks[13], (hidden,)),
    }

    out = new_expert_forward(x, attention_mask, params, num_heads=num_heads, eps=eps)
    jax.block_until_ready(out)

    ref = _reference(x, attention_mask, params, num_heads=num_heads, eps=eps)
    assert out.shape == ref.shape
    assert bool(jnp.allclose(out, ref, atol=1e-4, rtol=1e-4)), "mismatch vs reference"

    print("KERNEL_OK")
</pallas_src>

<mosaic_0001>
module attributes {stable_mosaic.version = 11 : i64} {
  func.func @_attention_kernel(%arg0: i32, %arg1: i32, %arg2: memref<1x8x128xf32, #tpu.memory_space<vmem>>, %arg3: memref<1x8x128xf32, #tpu.memory_space<vmem>>, %arg4: memref<1x1x8xi32, #tpu.memory_space<vmem>>, %arg5: memref<128x128xf32, #tpu.memory_space<vmem>>, %arg6: memref<128x128xf32, #tpu.memory_space<vmem>>, %arg7: memref<128x128xf32, #tpu.memory_space<vmem>>, %arg8: memref<128x128xf32, #tpu.memory_space<vmem>>, %arg9: memref<1x128xf32, #tpu.memory_space<vmem>>, %arg10: memref<1x128xf32, #tpu.memory_space<vmem>>, %arg11: memref<1x128xf32, #tpu.memory_space<vmem>>, %arg12: memref<8x128xf32, #tpu.memory_space<vmem>>) attributes {dimension_semantics = [#tpu.dimension_semantics<parallel>, #tpu.dimension_semantics<parallel>], iteration_bounds = array<i64: 2, 1>, scalar_prefetch = 0 : i64, scratch_operands = 0 : i64, tpu.core_type = #tpu.core_type<tc>, window_params = [{transform_indices = @transform_0, window_bounds = array<i64: 1, 8, 128>}, {transform_indices = @transform_1, window_bounds = array<i64: 1, 8, 128>}, {transform_indices = @transform_2, window_bounds = array<i64: 1, 1, 8>}, {pipeline_mode = #tpu.pipeline_mode<synchronous>, transform_indices = @transform_3, window_bounds = array<i64: 128, 128>}, {pipeline_mode = #tpu.pipeline_mode<synchronous>, transform_indices = @transform_4, window_bounds = array<i64: 128, 128>}, {pipeline_mode = #tpu.pipeline_mode<synchronous>, transform_indices = @transform_5, window_bounds = array<i64: 128, 128>}, {pipeline_mode = #tpu.pipeline_mode<synchronous>, transform_indices = @transform_6, window_bounds = array<i64: 128, 128>}, {pipeline_mode = #tpu.pipeline_mode<synchronous>, transform_indices = @transform_7, window_bounds = array<i64: 1, 128>}, {pipeline_mode = #tpu.pipeline_mode<synchronous>, transform_indices = @transform_8, window_bounds = array<i64: 1, 128>}, {pipeline_mode = #tpu.pipeline_mode<synchronous>, transform_indices = @transform_9, window_bounds = array<i64: 1, 128>}, {transform_indices = @transform_10, window_bounds = array<i64: 8, 128>}]} {
    %c0 = arith.constant 0 : index
    %c0_0 = arith.constant 0 : index
    %c0_1 = arith.constant 0 : index
    %0 = vector.load %arg2[%c0, %c0_0, %c0_1] : memref<1x8x128xf32, #tpu.memory_space<vmem>>, vector<1x8x128xf32>
    %1 = vector.shape_cast %0 : vector<1x8x128xf32> to vector<8x128xf32>
    %c0_2 = arith.constant 0 : index
    %c0_3 = arith.constant 0 : index
    %c0_4 = arith.constant 0 : index
    %2 = vector.load %arg3[%c0_2, %c0_3, %c0_4] : memref<1x8x128xf32, #tpu.memory_space<vmem>>, vector<1x8x128xf32>
    %3 = vector.shape_cast %2 : vector<1x8x128xf32> to vector<8x128xf32>
    %c0_5 = arith.constant 0 : index
    %c0_6 = arith.constant 0 : index
    %c0_7 = arith.constant 0 : index
    %4 = vector.load %arg4[%c0_5, %c0_6, %c0_7] : memref<1x1x8xi32, #tpu.memory_space<vmem>>, vector<1x1x8xi32>
    %5 = vector.shape_cast %4 : vector<1x1x8xi32> to vector<1x8xi32>
    %c0_i32 = arith.constant 0 : i32
    %6 = vector.broadcast %c0_i32 : i32 to vector<1x8xi32>
    %7 = arith.cmpi eq, %5, %6 : vector<1x8xi32>
    %cst = arith.constant 0xFF800000 : f32
    %cst_8 = arith.constant 0.000000e+00 : f32
    %8 = vector.broadcast %cst : f32 to vector<1x8xf32>
    %9 = vector.broadcast %cst_8 : f32 to vector<1x8xf32>
    %10 = arith.select %7, %8, %9 : vector<1x8xi1>, vector<1x8xf32>
    %c0_9 = arith.constant 0 : index
    %c0_10 = arith.constant 0 : index
    %11 = vector.load %arg5[%c0_9, %c0_10] : memref<128x128xf32, #tpu.memory_space<vmem>>, vector<128x128xf32>
    %cst_11 = arith.constant dense<0.000000e+00> : vector<8x128xf32>
    %12 = tpu.matmul %1, %11, %cst_11 {dimension_numbers = #tpu.dot_dimension_numbers<[1], [0], [0], [1], [0, 0, 1, 1], [], []>} : vector<8x128xf32>, vector<128x128xf32>, vector<8x128xf32> -> vector<8x128xf32>
    %cst_12 = arith.constant 0.176776692 : f32
    %13 = vector.broadcast %cst_12 : f32 to vector<8x128xf32>
    %14 = arith.mulf %12, %13 : vector<8x128xf32>
    %c0_13 = arith.constant 0 : index
    %c0_14 = arith.constant 0 : index
    %15 = vector.load %arg6[%c0_13, %c0_14] : memref<128x128xf32, #tpu.memory_space<vmem>>, vector<128x128xf32>
    %cst_15 = arith.constant dense<0.000000e+00> : vector<8x128xf32>
    %16 = tpu.matmul %3, %15, %cst_15 {dimension_numbers = #tpu.dot_dimension_numbers<[1], [0], [0], [1], [0, 0, 1, 1], [], []>} : vector<8x128xf32>, vector<128x128xf32>, vector<8x128xf32> -> vector<8x128xf32>
    %c0_16 = arith.constant 0 : index
    %c0_17 = arith.constant 0 : index
    %17 = vector.load %arg7[%c0_16, %c0_17] : memref<128x128xf32, #tpu.memory_space<vmem>>, vector<128x128xf32>
    %cst_18 = arith.constant dense<0.000000e+00> : vector<8x128xf32>
    %18 = tpu.matmul %3, %17, %cst_18 {dimension_numbers = #tpu.dot_dimension_numbers<[1], [0], [0], [1], [0, 0, 1, 1], [], []>} : vector<8x128xf32>, vector<128x128xf32>, vector<8x128xf32> -> vector<8x128xf32>
    %19 = vector.extract_strided_slice %14 {offsets = [0, 0], sizes = [8, 16], strides = [1, 1]} : vector<8x128xf32> to vector<8x16xf32>
    %20 = vector.extract_strided_slice %16 {offsets = [0, 0], sizes = [8, 16], strides = [1, 1]} : vector<8x128xf32> to vector<8x16xf32>
    %cst_19 = arith.constant dense<0.000000e+00> : vector<8x8xf32>
    %21 = tpu.matmul %19, %20, %cst_19 {dimension_numbers = #tpu.dot_dimension_numbers<[1], [1], [0], [0], [0, 0, 1, 0], [], []>} : vector<8x16xf32>, vector<8x16xf32>, vector<8x8xf32> -> vector<8x8xf32>
    %22 = vector.broadcast %10 : vector<1x8xf32> to vector<8x8xf32>
    %23 = arith.addf %21, %22 : vector<8x8xf32>
    %cst_20 = arith.constant dense<0xFF800000> : vector<8xf32>
    %24 = vector.multi_reduction <maximumf>, %23, %cst_20 [1] : vector<8x8xf32> to vector<8xf32>
    %25 = vector.shape_cast %24 : vector<8xf32> to vector<8x1xf32>
    %26 = vector.broadcast %25 : vector<8x1xf32> to vector<8x8xf32>
    %27 = arith.subf %23, %26 : vector<8x8xf32>
    %28 = math.exp %27 : vector<8x8xf32>
    %cst_21 = arith.constant dense<0.000000e+00> : vector<8xf32>
    %29 = vector.multi_reduction <add>, %28, %cst_21 [1] : vector<8x8xf32> to vector<8xf32>
    %30 = vector.shape_cast %29 : vector<8xf32> to vector<8x1xf32>
    %31 = vector.extract_strided_slice %18 {offsets = [0, 0], sizes = [8, 16], strides = [1, 1]} : vector<8x128xf32> to vector<8x16xf32>
    %cst_22 = arith.constant dense<0.000000e+00> : vector<8x16xf32>
    %32 = tpu.matmul %28, %31, %cst_22 {dimension_numbers = #tpu.dot_dimension_numbers<[1], [0], [0], [1], [0, 0, 1, 1], [], []>} : vector<8x8xf32>, vector<8x16xf32>, vector<8x16xf32> -> vector<8x16xf32>
    %33 = tpu.reciprocal %30 : vector<8x1xf32> -> vector<8x1xf32>
    %34 = vector.broadcast %33 : vector<8x1xf32> to vector<8x16xf32>
    %35 = arith.mulf %32, %34 : vector<8x16xf32>
    %36 = vector.extract_strided_slice %14 {offsets = [0, 16], sizes = [8, 16], strides = [1, 1]} : vector<8x128xf32> to vector<8x16xf32>
    %37 = vector.extract_strided_slice %16 {offsets = [0, 16], sizes = [8, 16], strides = [1, 1]} : vector<8x128xf32> to vector<8x16xf32>
    %cst_23 = arith.constant dense<0.000000e+00> : vector<8x8xf32>
    %38 = tpu.matmul %36, %37, %cst_23 {dimension_numbers = #tpu.dot_dimension_numbers<[1], [1], [0], [0], [0, 0, 1, 0], [], []>} : vector<8x16xf32>, vector<8x16xf32>, vector<8x8xf32> -> vector<8x8xf32>
    %39 = vector.broadcast %10 : vector<1x8xf32> to vector<8x8xf32>
    %40 = arith.addf %38, %39 : vector<8x8xf32>
    %cst_24 = arith.constant dense<0xFF800000> : vector<8xf32>
    %41 = vector.multi_reduction <maximumf>, %40, %cst_24 [1] : vector<8x8xf32> to vector<8xf32>
    %42 = vector.shape_cast %41 : vector<8xf32> to vector<8x1xf32>
    %43 = vector.broadcast %42 : vector<8x1xf32> to vector<8x8xf32>
    %44 = arith.subf %40, %43 : vector<8x8xf32>
    %45 = math.exp %44 : vector<8x8xf32>
    %cst_25 = arith.constant dense<0.000000e+00> : vector<8xf32>
    %46 = vector.multi_reduction <add>, %45, %cst_25 [1] : vector<8x8xf32> to vector<8xf32>
    %47 = vector.shape_cast %46 : vector<8xf32> to vector<8x1xf32>
    %48 = vector.extract_strided_slice %18 {offsets = [0, 16], sizes = [8, 16], strides = [1, 1]} : vector<8x128xf32> to vector<8x16xf32>
    %cst_26 = arith.constant dense<0.000000e+00> : vector<8x16xf32>
    %49 = tpu.matmul %45, %48, %cst_26 {dimension_numbers = #tpu.dot_dimension_numbers<[1], [0], [0], [1], [0, 0, 1, 1], [], []>} : vector<8x8xf32>, vector<8x16xf32>, vector<8x16xf32> -> vector<8x16xf32>
    %50 = tpu.reciprocal %47 : vector<8x1xf32> -> vector<8x1xf32>
    %51 = vector.broadcast %50 : vector<8x1xf32> to vector<8x16xf32>
    %52 = arith.mulf %49, %51 : vector<8x16xf32>
    %53 = tpu.concatenate %35, %52 in 1 : vector<8x16xf32>, vector<8x16xf32> -> vector<8x32xf32>
    %c0_27 = arith.constant 0 : index
    %c0_28 = arith.constant 0 : index
    %54 = vector.load %arg8[%c0_27, %c0_28] : memref<128x128xf32, #tpu.memory_space<vmem>>, vector<32x128xf32>
    %cst_29 = arith.constant dense<0.000000e+00> : vector<8x128xf32>
    %55 = tpu.matmul %53, %54, %cst_29 {dimension_numbers = #tpu.dot_dimension_numbers<[1], [0], [0], [1], [0, 0, 1, 1], [], []>} : vector<8x32xf32>, vector<32x128xf32>, vector<8x128xf32> -> vector<8x128xf32>
    %c0_30 = arith.constant 0 : index
    %c0_31 = arith.constant 0 : index
    %56 = vector.load %arg9[%c0_30, %c0_31] : memref<1x128xf32, #tpu.memory_space<vmem>>, vector<1x128xf32>
    %57 = vector.broadcast %56 : vector<1x128xf32> to vector<8x128xf32>
    %58 = arith.addf %55, %57 : vector<8x128xf32>
    %59 = arith.addf %58, %1 : vector<8x128xf32>
    %60 = tpu.iota {dimensions = array<i32: 1>} : vector<8x128xi32>
    %c32_i32 = arith.constant 32 : i32
    %61 = vector.broadcast %c32_i32 : i32 to vector<8x128xi32>
    %62 = arith.cmpi slt, %60, %61 : vector<8x128xi32>
    %63 = arith.extui %62 : vector<8x128xi1> to vector<8x128xi32>
    %64 = arith.sitofp %63 : vector<8x128xi32> to vector<8x128xf32>
    %65 = arith.mulf %59, %64 : vector<8x128xf32>
    %cst_32 = arith.constant dense<0.000000e+00> : vector<8xf32>
    %66 = vector.multi_reduction <add>, %65, %cst_32 [1] : vector<8x128xf32> to vector<8xf32>
    %67 = vector.shape_cast %66 : vector<8xf32> to vector<8x1xf32>
    %cst_33 = arith.constant 3.125000e-02 : f32
    %68 = vector.broadcast %cst_33 : f32 to vector<8x1xf32>
    %69 = arith.mulf %67, %68 : vector<8x1xf32>
    %70 = vector.broadcast %69 : vector<8x1xf32> to vector<8x128xf32>
    %71 = arith.subf %59, %70 : vector<8x128xf32>
    %72 = arith.mulf %71, %64 : vector<8x128xf32>
    %73 = arith.mulf %72, %72 : vector<8x128xf32>
    %cst_34 = arith.constant dense<0.000000e+00> : vector<8xf32>
    %74 = vector.multi_reduction <add>, %73, %cst_34 [1] : vector<8x128xf32> to vector<8xf32>
    %75 = vector.shape_cast %74 : vector<8xf32> to vector<8x1xf32>
    %cst_35 = arith.constant 3.125000e-02 : f32
    %76 = vector.broadcast %cst_35 : f32 to vector<8x1xf32>
    %77 = arith.mulf %75, %76 : vector<8x1xf32>
    %cst_36 = arith.constant 9.99999996E-13 : f32
    %78 = vector.broadcast %cst_36 : f32 to vector<8x1xf32>
    %79 = arith.addf %77, %78 : vector<8x1xf32>
    %80 = math.rsqrt %79 : vector<8x1xf32>
    %81 = vector.broadcast %80 : vector<8x1xf32> to vector<8x128xf32>
    %82 = arith.mulf %72, %81 : vector<8x128xf32>
    %c0_37 = arith.constant 0 : index
    %c0_38 = arith.constant 0 : index
    %83 = vector.load %arg10[%c0_37, %c0_38] : memref<1x128xf32, #tpu.memory_space<vmem>>, vector<1x128xf32>
    %84 = vector.broadcast %83 : vector<1x128xf32> to vector<8x128xf32>
    %85 = arith.mulf %82, %84 : vector<8x128xf32>
    %c0_39 = arith.constant 0 : index
    %c0_40 = arith.constant 0 : index
    %86 = vector.load %arg11[%c0_39, %c0_40] : memref<1x128xf32, #tpu.memory_space<vmem>>, vector<1x128xf32>
    %87 = vector.broadcast %86 : vector<1x128xf32> to vector<8x128xf32>
    %88 = arith.addf %85, %87 : vector<8x128xf32>
    %c0_41 = arith.constant 0 : index
    %c0_42 = arith.constant 0 : index
    %89 = vector.load %arg12[%c0_41, %c0_42] : memref<8x128xf32, #tpu.memory_space<vmem>>, vector<8x128xf32>
    tpu.vector_store %arg12[%c0_41, %c0_42], %88 {strides = array<i32>} : memref<8x128xf32, #tpu.memory_space<vmem>>, vector<8x128xf32>,
    return
  }
  func.func @transform_0(%arg0: i32, %arg1: i32) -> (i32, i32, i32) {
    %c0_i32 = arith.constant 0 : i32
    %c0_i32_0 = arith.constant 0 : i32
    return %arg0, %arg1, %c0_i32 : i32, i32, i32
  }
  func.func @transform_1(%arg0: i32, %arg1: i32) -> (i32, i32, i32) {
    %c0_i32 = arith.constant 0 : i32
    %c0_i32_0 = arith.constant 0 : i32
    %c0_i32_1 = arith.constant 0 : i32
    return %arg0, %c0_i32, %c0_i32_0 : i32, i32, i32
  }
  func.func @transform_2(%arg0: i32, %arg1: i32) -> (i32, i32, i32) {
    %c0_i32 = arith.constant 0 : i32
    %c0_i32_0 = arith.constant 0 : i32
    %c0_i32_1 = arith.constant 0 : i32
    return %arg0, %c0_i32, %c0_i32_0 : i32, i32, i32
  }
  func.func @transform_3(%arg0: i32, %arg1: i32) -> (i32, i32) {
    %c0_i32 = arith.constant 0 : i32
    %c0_i32_0 = arith.constant 0 : i32
    %c0_i32_1 = arith.constant 0 : i32
    return %c0_i32, %c0_i32_0 : i32, i32
  }
  func.func @transform_4(%arg0: i32, %arg1: i32) -> (i32, i32) {
    %c0_i32 = arith.constant 0 : i32
    %c0_i32_0 = arith.constant 0 : i32
    %c0_i32_1 = arith.constant 0 : i32
    return %c0_i32, %c0_i32_0 : i32, i32
  }
  func.func @transform_5(%arg0: i32, %arg1: i32) -> (i32, i32) {
    %c0_i32 = arith.constant 0 : i32
    %c0_i32_0 = arith.constant 0 : i32
    %c0_i32_1 = arith.constant 0 : i32
    return %c0_i32, %c0_i32_0 : i32, i32
  }
  func.func @transform_6(%arg0: i32, %arg1: i32) -> (i32, i32) {
    %c0_i32 = arith.constant 0 : i32
    %c0_i32_0 = arith.constant 0 : i32
    %c0_i32_1 = arith.constant 0 : i32
    return %c0_i32, %c0_i32_0 : i32, i32
  }
  func.func @transform_7(%arg0: i32, %arg1: i32) -> (i32, i32) {
    %c0_i32 = arith.constant 0 : i32
    %c0_i32_0 = arith.constant 0 : i32
    %c0_i32_1 = arith.constant 0 : i32
    return %c0_i32, %c0_i32_0 : i32, i32
  }
  func.func @transform_8(%arg0: i32, %arg1: i32) -> (i32, i32) {
    %c0_i32 = arith.constant 0 : i32
    %c0_i32_0 = arith.constant 0 : i32
    %c0_i32_1 = arith.constant 0 : i32
    return %c0_i32, %c0_i32_0 : i32, i32
  }
  func.func @transform_9(%arg0: i32, %arg1: i32) -> (i32, i32) {
    %c0_i32 = arith.constant 0 : i32
    %c0_i32_0 = arith.constant 0 : i32
    %c0_i32_1 = arith.constant 0 : i32
    return %c0_i32, %c0_i32_0 : i32, i32
  }
  func.func @transform_10(%arg0: i32, %arg1: i32) -> (i32, i32) {
    %c1_i32 = arith.constant 1 : i32
    %0 = arith.muli %arg0, %c1_i32 : i32
    %1 = arith.addi %0, %arg1 : i32
    %c0_i32 = arith.constant 0 : i32
    %c0_i32_0 = arith.constant 0 : i32
    return %1, %c0_i32 : i32, i32
  }
}

</mosaic_0001>

<bundles_post_ra>
// kernel: tpu_custom_call.1
= control target key start
LH: loop header
LB: loop body
LE: loop exit
PB: predicated region body
PF: predicated region fallthrough
CT: control target
= control target key end

     0   :  { %s2602_s0 = inlined_call_operand.hbm [shape: f32[2,8,128], index: 0, kind: input, shape index: {}]   ;;  %s2603_s1 = inlined_call_operand.hbm [shape: f32[2,8,128], index: 1, kind: input, shape index: {}]   ;;  %s2604_s2 = inlined_call_operand.vmem [shape: s32[2,1,8], index: 2, kind: input, shape index: {}]   ;;  %s2605_s3 = inlined_call_operand.hbm [shape: f32[128,128], index: 3, kind: input, shape index: {}]   ;;  %s2606_s4 = inlined_call_operand.hbm [shape: f32[128,128], index: 4, kind: input, shape index: {}]   ;;  %s2607_s5 = inlined_call_operand.hbm [shape: f32[128,128], index: 5, kind: input, shape index: {}]   ;;  %s2608_s6 = inlined_call_operand.hbm [shape: f32[128,128], index: 6, kind: input, shape index: {}]   ;;  %s2609_s7 = inlined_call_operand.vmem [shape: f32[1,128], index: 7, kind: input, shape index: {}]   ;;  %s2610_s8 = inlined_call_operand.vmem [shape: f32[1,128], index: 8, kind: input, shape index: {}]   ;;  %s2611_s9 = inlined_call_operand.vmem [shape: f32[1,128], index: 9, kind: input, shape index: {}]   ;;  %s2612_s10 = inlined_call_operand.hbm [shape: f32[16,128], index: 10, kind: output, shape index: {}]  }
   0x1   :  { %2619 = sst [smem:[#allocation21_spill]] %s2605_s3 }
   0x2   :  { %2620 = sst [smem:[#allocation22_spill]] %s2606_s4 }
   0x3   :  { %2621 = sst [smem:[#allocation23_spill]] %s2607_s5 }
   0x4   :  { %2622 = sst [smem:[#allocation24_spill]] %s2608_s6 }
   0x5   :  { %2623 = sst [smem:[#allocation25_spill]] %s2609_s7 }
   0x6   :  { %2624 = sst [smem:[#allocation26_spill]] %s2610_s8 }
   0x7   :  { %2625 = sst [smem:[#allocation27_spill]] %s2611_s9 }
   0x8   :  { %2626 = sst [smem:[#allocation28_spill]] %s2612_s10 }
   0x9   :  { %15 = vsyncpa [#allocation3], 0 }
   0xa   :  { %17 = vsyncpa [#allocation3 + $0x1], 0 }
   0xb   :  { %18 = vsyncpa [#allocation6], 0 }
   0xc   :  { %20 = vsyncpa [#allocation6 + $0x1], 0 }
   0xd   :  { %21 = vsyncpa [#allocation9], 0 }
   0xe   :  { %22 = vsyncpa [#allocation12], 0 }
   0xf   :  { %23 = vsyncpa [#allocation4], 0 }
  0x10   :  { %25 = vsyncpa [#allocation4 + $0x1], 0  ;;  %s2170_s13 = smov 0   ;;  %s2172_s14 = smov 0  }
  0x11   :  { %s2174_s15 = smov 0   ;;  %s2176_s16 = smov 0  }
  0x12   :  { %s2178_s17 = smov 0   ;;  %s2180_s18 = smov 0  }
  0x13 LB: > { %s2201_s19 = sadd.s32 4294967295, %s2099_s18   ;;  %p1393_p0 = scmp.ge.s32.totalorder %s2099_s18, 1  ;;  %s2099_s18 = sphi %s2180_s18, %s31_s18   ;;  %s2095_s17 = sphi %s2178_s17, %s2661_s17   ;;  %s2091_s16 = sphi %s2176_s16, %s2660_s16   ;;  %s2087_s15 = sphi %s2174_s15, %s2659_s15   ;;  %s2083_s14 = sphi %s2172_s14, %s2658_s14   ;;  %s2079_s13 = sphi %s2170_s13, %s2657_s13  }
  0x14   : > { %p2614_p1 = scmp.eq.s32.totalorder %s2201_s19, 0  ;;  %p303_p2 = scmp.lt.s32.totalorder %s2099_s18, 3 }
  0x15   : > { %s2101_s21 = smov [#allocation7]   ;;  %s2102_s24 = smov [#allocation8]  }
  0x16   : > { %p2206_p3 = pnand %p1393_p0, %p303_p2  ;;  %s315_s22 = sshll.u32 %s2101_s21, 4  ;;  %s2210_s22 = int_to_ptr.vmem [resolvable:$true] %s315_s22 }
  0x17   : > { %s328_s25 = sshll.u32 %s2102_s24, 4  ;;  %s2103_s26 = smov [#allocation10]   ;;  %s2221_s25 = int_to_ptr.vmem [resolvable:$true] %s328_s25 }
  0x18   : > { %s2627_s20 = scalar_select %p2206_p3, 1, 0 }
  0x19   : > { %p1726_p4 = pneg %p2206_p3  ;;  %s2223_s27 = sshll.u32 %s2103_s26, 4  ;;  %s342_s27 = int_to_ptr.vmem [resolvable:$true] %s2223_s27 }
  0x1a   : > { %s2629_s3 = sld [smem:[#allocation21_spill]] }
  0x1b   : > { %p2217_p6 = pnand %p1726_p4, %p2614_p1 }
  0x1d   : > { %p2233_p8 = pneg %p2217_p6 }
  0x20   : > { %s1829_s30 = scalar_lea.hbm %s2629_s3, 2048 }
  0x21   : > { %p1830_p7 = scmp.ne.s32.totalorder %s2629_s3, %s1829_s30  ;;  %p1836_p11 = scmp.lt.u32.totalorder %s1829_s30, %s2629_s3 }
  0x23   : > { %p1832_p9 = pnand %p2233_p8, %p1830_p7 }
  0x25   : > { %p1833_p10 = pneg %p1832_p9 }
  0x27   : > { %p1838_p12 = pnand %p1836_p11, %p1833_p10 }
  0x29   : > { %1841 = shalt.err (!%p1838_p12)
}
  0x2a   : > { %s1842_s28 = scalar_lea.vmem %s2210_s22, 2048  ;;  %p1850_p4 = scmp.lt.s32.totalorder %s2210_s22, %s2210_s22 }
  0x2b   : > { %p1843_p13 = scmp.ne.s32.totalorder %s2210_s22, %s1842_s28  ;;  %p1851_p5 = scmp.lt.s32.totalorder %s1842_s28, %s1842_s28 }
  0x2d   : > { %p1845_p0 = pnand %p1843_p13, %p2233_p8  ;;  %p1852_p7 = por %p1851_p5, %p1850_p4 }
  0x2f   : > { %p1846_p2 = pneg %p1845_p0 }
  0x31   : > { %p1853_p9 = pnand %p1852_p7, %p1846_p2 }
  0x33   : > { %1856 = shalt.err (!%p1853_p9)
}
  0x34   : > { %s2104_s29 = smov 128   ;;  %s2105_s30 = smov 8  }
  0x35   : > { %1729 = dma.hbm_to_vmem [thread:$0]  (!%p2217_p6), %s2629_s3, 2048, %s2210_s22, [#allocation6], %s2104_s29, %s2104_s29, %s2105_s30  }
  0x36   : > { %s2631_s4 = sld [smem:[#allocation22_spill]] }
  0x3c   : > { %s1857_s28 = scalar_lea.hbm %s2631_s4, 2048 }
  0x3d   : > { %p1858_p5 = scmp.ne.s32.totalorder %s2631_s4, %s1857_s28  ;;  %p1864_p12 = scmp.lt.u32.totalorder %s1857_s28, %s2631_s4 }
  0x3f   : > { %p1860_p10 = pnand %p1858_p5, %p2233_p8 }
  0x41   : > { %p1861_p11 = pneg %p1860_p10 }
  0x43   : > { %p1866_p13 = pnand %p1864_p12, %p1861_p11 }
  0x45   : > { %1869 = shalt.err (!%p1866_p13)
}
  0x46   : > { %s1870_s22 = scalar_lea.vmem %s2221_s25, 2048  ;;  %p1878_p7 = scmp.lt.s32.totalorder %s2221_s25, %s2221_s25 }
  0x47   : > { %p1871_p0 = scmp.ne.s32.totalorder %s2221_s25, %s1870_s22  ;;  %p1879_p9 = scmp.lt.s32.totalorder %s1870_s22, %s1870_s22 }
  0x49   : > { %p1873_p2 = pnand %p1871_p0, %p2233_p8  ;;  %p1880_p5 = por %p1879_p9, %p1878_p7 }
  0x4b   : > { %p1874_p4 = pneg %p1873_p2 }
  0x4d   : > { %p1881_p10 = pnand %p1880_p5, %p1874_p4 }
  0x4f   : > { %1884 = shalt.err (!%p1881_p10)
}
  0x50   : > { %1732 = dma.hbm_to_vmem [thread:$0]  (!%p2217_p6), %s2631_s4, 2048, %s2221_s25, [#allocation9], %s2104_s29, %s2104_s29, %s2105_s30  }
  0x51   : > { %s2632_s5 = sld [smem:[#allocation23_spill]] }
  0x57   : > { %s1885_s11 = scalar_lea.hbm %s2632_s5, 2048 }
  0x58   : > { %p1886_p11 = scmp.ne.s32.totalorder %s2632_s5, %s1885_s11  ;;  %p1892_p0 = scmp.lt.u32.totalorder %s1885_s11, %s2632_s5 }
  0x5a   : > { %p1888_p12 = pnand %p1886_p11, %p2233_p8 }
  0x5c   : > { %p1889_p13 = pneg %p1888_p12 }
  0x5e   : > { %p1894_p2 = pnand %p1892_p0, %p1889_p13 }
  0x60   : > { %1897 = shalt.err (!%p1894_p2)
}
  0x61   : > { %s1898_s22 = scalar_lea.vmem %s342_s27, 2048  ;;  %p1906_p5 = scmp.lt.s32.totalorder %s342_s27, %s342_s27 }
  0x62   : > { %p1899_p4 = scmp.ne.s32.totalorder %s342_s27, %s1898_s22  ;;  %p1907_p10 = scmp.lt.s32.totalorder %s1898_s22, %s1898_s22 }
  0x64   : > { %p1901_p7 = pnand %p1899_p4, %p2233_p8  ;;  %p1908_p1 = por %p1907_p10, %p1906_p5 }
  0x66   : > { %p1902_p9 = pneg %p1901_p7 }
  0x68   : > { %p1909_p3 = pnand %p1908_p1, %p1902_p9 }
  0x6a   : > { %1912 = shalt.err (!%p1909_p3)
}
  0x6b   : > { %1735 = dma.hbm_to_vmem [thread:$0]  (!%p2217_p6), %s2632_s5, 2048, %s342_s27, [#allocation9], %s2104_s29, %s2104_s29, %s2105_s30  }
  0x6c   : > { %s2106_s8 = smov [#allocation11]   ;;  %s2633_s6 = sld [smem:[#allocation24_spill]] }
  0x6d   : > { %s354_s9 = sshll.u32 %s2106_s8, 4  ;;  %s355_s9 = int_to_ptr.vmem [resolvable:$true] %s354_s9 }
  0x72   : > { %s1913_s12 = scalar_lea.hbm %s2633_s6, 2048 }
  0x73   : > { %p1914_p1 = scmp.ne.s32.totalorder %s2633_s6, %s1913_s12  ;;  %p1920_p12 = scmp.lt.u32.totalorder %s1913_s12, %s2633_s6 }
  0x75   : > { %p1916_p3 = pnand %p1914_p1, %p2233_p8 }
  0x77   : > { %p1917_p11 = pneg %p1916_p3 }
  0x79   : > { %p1922_p13 = pnand %p1920_p12, %p1917_p11 }
  0x7b   : > { %1925 = shalt.err (!%p1922_p13)
}
  0x7c   : > { %s1926_s27 = scalar_lea.vmem %s355_s9, 2048  ;;  %p1934_p7 = scmp.lt.s32.totalorder %s355_s9, %s355_s9 }
  0x7d   : > { %p1927_p0 = scmp.ne.s32.totalorder %s355_s9, %s1926_s27  ;;  %p1935_p9 = scmp.lt.s32.totalorder %s1926_s27, %s1926_s27 }
  0x7f   : > { %p1929_p2 = pnand %p1927_p0, %p2233_p8  ;;  %p1936_p5 = por %p1935_p9, %p1934_p7 }
  0x81   : > { %p1930_p4 = pneg %p1929_p2 }
  0x83   : > { %p1937_p10 = pnand %p1936_p5, %p1930_p4 }
  0x85   : > { %1940 = shalt.err (!%p1937_p10)
}
  0x86   : > { %1738 = dma.hbm_to_vmem [thread:$0]  (!%p2217_p6), %s2633_s6, 2048, %s355_s9, [#allocation12], %s2104_s29, %s2104_s29, %s2105_s30  }
  0x87   : > { %s1392_s23 = sadd.s32 4294967294, %s2099_s18   ;;  %s43_s21 = sadd.s32 1, %s2095_s17 }
  0x88   : > { %p45_p8 = scmp.ge.s32.totalorder %s43_s21, 2  ;;  %s52_s8 = sadd.s32 1, %s2087_s15 }
  0x89   : > { %p59_p1 = scmp.ne.s32.totalorder %s2087_s15, %s2083_s14  ;;  %p60_p3 = scmp.eq.s32.totalorder %s2099_s18, 0 }
  0x8a   : > { %s2663_s21 = smov (%p45_p8, %s43_s21), 0  ;;  %p65_p12 = scmp.ne.s32.totalorder %s2083_s14, %s2079_s13 }
  0x8b   : > { %2634 = sst [smem:[#allocation20_spill]] %s2663_s21  ;;  %p2334_p11 = por %p60_p3, %p59_p1 }
  0x8c   : > { %s47_s29 = ssub.s32 %s2095_s17, %s2663_s21  ;;  %p290_p6 = scmp.eq.s32.totalorder %s2201_s19, 1 }
  0x8d   : > { %p50_p13 = scmp.eq.s32.totalorder %s47_s29, 0  ;;  %p2636_p0 = scmp.eq.s32.totalorder %s2201_s19, 0 }
  0x8e   : > { %p2349_p4 = por %p290_p6, %p59_p1  ;;  %p296_p7 = scmp.eq.s32.totalorder %s1392_s23, 1 }
  0x8f   : > { %p2345_p2 = por %p2636_p0, %p65_p12  ;;  %p1754_p5 = scmp.lt.s32.totalorder %s2099_s18, 2 }
  0x90   : > { %s2638_s9 = scalar_select %p2349_p4, 1, 0 }
  0x91   : > { %s2637_s30 = scalar_select %p2345_p2, 1, 0 }
  0x92   : > { %s2354_s11 = scalar_select %p50_p13, %s2087_s15, %s52_s8  }
  0x93   : > { %p2356_p9 = por %p296_p7, %p65_p12  ;;  %s377_s24 = sand.u32 1, %s2087_s15  }
  0x94   : > { %s1400_s26 = sshll.u32 %s2095_s17, 7  ;;  %s2363_s28 = sshll.u32 %s377_s24, 3 }
  0x95   : > { %s2639_s12 = scalar_select %p2356_p9, 1, 0 }
  0x96   : > { %s2368_s25 = scalar_lea.hbm %s2602_s0, %s1400_s26  ;;  %s381_s7 = scalar_lea.vmem [#allocation2], %s2363_s28 }
  0x97   : > { %s389_s23 = sshll.u32 %s381_s7, 4  ;;  %p2373_p10 = pnand %p1754_p5, %p2334_p11  ;;  %s2377_s23 = int_to_ptr.vmem [resolvable:$true] %s389_s23 }
  0x98   : > { %s2382_s27 = scalar_lea.hbm %s2603_s1, %s1400_s26  ;;  %s378_s3 = scalar_lea.sflag [#allocation3], %s377_s24 }
  0x99   : > { %s1941_s4 = scalar_lea.hbm %s2368_s25, 128  ;;  %p1943_p1 = pneg %p2373_p10 }
  0x9a   : > { %p1942_p8 = scmp.ne.s32.totalorder %s2368_s25, %s1941_s4  ;;  %s1946_s5 = scalar_lea.hbm %s2602_s0, 256 }
  0x9b   : > { %p1947_p12 = scmp.lt.u32.totalorder %s2368_s25, %s2602_s0  ;;  %p1948_p6 = scmp.lt.u32.totalorder %s1946_s5, %s1941_s4 }
  0x9c   : > { %p1944_p3 = pnand %p1943_p1, %p1942_p8  ;;  %p1950_p0 = scmp.lt.u32.totalorder %s1941_s4, %s2368_s25 }
  0x9d   : > { %p1949_p13 = por %p1948_p6, %p1947_p12 }
  0x9e   : > { %p1945_p11 = pneg %p1944_p3 }
  0x9f   : > { %p1951_p7 = por %p1950_p0, %p1949_p13 }
  0xa1   : > { %p1952_p5 = pnand %p1951_p7, %p1945_p11 }
  0xa3   : > { %1955 = shalt.err (!%p1952_p5)
}
  0xa4   : > { %s1956_s24 = scalar_lea.vmem %s2377_s23, 128  ;;  %s2107_s26 = smov [#allocation2]  }
  0xa5   : > { %p1957_p8 = scmp.ne.s32.totalorder %s2377_s23, %s1956_s24  ;;  %s1961_s29 = sshll.u32 %s2107_s26, 4  ;;  %s1962_s29 = int_to_ptr.vmem [resolvable:$false] %s1961_s29 }
  0xa6   : > { %s1963_s6 = scalar_lea.vmem %s1962_s29, 256  ;;  %p1964_p4 = scmp.lt.s32.totalorder %s2377_s23, %s1962_s29 }
  0xa7   : > { %p1959_p3 = pnand %p1957_p8, %p1943_p1  ;;  %p1965_p12 = scmp.lt.s32.totalorder %s1963_s6, %s1956_s24 }
  0xa9   : > { %p1960_p9 = pneg %p1959_p3  ;;  %p1966_p6 = por %p1965_p12, %p1964_p4 }
  0xab   : > { %p1967_p13 = pnand %p1966_p6, %p1960_p9 }
  0xad   : > { %1970 = shalt.err (!%p1967_p13)
}
  0xae   : > { %1742 = dma.hbm_to_vmem [thread:$0]  (!%p2373_p10), %s2368_s25, 128, %s2377_s23, %s378_s3  }
  0xaf   : > { %s396_s4 = sand.u32 1, %s2099_s18   ;;  %s400_s5 = scalar_lea.vmem [#allocation5], %s2363_s28 }
  0xb0   : > { %s407_s21 = sshll.u32 %s400_s5, 4  ;;  %s397_s22 = scalar_lea.sflag [#allocation6], %s396_s4  ;;  %s408_s21 = int_to_ptr.vmem [resolvable:$true] %s407_s21 }
  0xb1   : > { %s1971_s10 = scalar_lea.hbm %s2382_s27, 128  ;;  %s1976_s26 = scalar_lea.hbm %s2603_s1, 256 }
  0xb2   : > { %p1972_p4 = scmp.ne.s32.totalorder %s2382_s27, %s1971_s10  ;;  %p1977_p0 = scmp.lt.u32.totalorder %s2382_s27, %s2603_s1 }
  0xb3   : > { %p1978_p7 = scmp.lt.u32.totalorder %s1976_s26, %s1971_s10  ;;  %p1980_p8 = scmp.lt.u32.totalorder %s1971_s10, %s2382_s27 }
  0xb4   : > { %p1974_p9 = pnand %p1972_p4, %p1943_p1 }
  0xb5   : > { %p1979_p5 = por %p1978_p7, %p1977_p0 }
  0xb6   : > { %p1975_p11 = pneg %p1974_p9 }
  0xb7   : > { %p1981_p3 = por %p1980_p8, %p1979_p5 }
  0xb9   : > { %p1982_p12 = pnand %p1981_p3, %p1975_p11 }
  0xbb   : > { %1985 = shalt.err (!%p1982_p12)
}
  0xbc   : > { %s1986_s3 = scalar_lea.vmem %s408_s21, 128  ;;  %s2108_s28 = smov [#allocation5]  }
  0xbd   : > { %p1987_p6 = scmp.ne.s32.totalorder %s408_s21, %s1986_s3  ;;  %s1991_s25 = sshll.u32 %s2108_s28, 4  ;;  %s1992_s25 = int_to_ptr.vmem [resolvable:$false] %s1991_s25 }
  0xbe   : > { %s1993_s23 = scalar_lea.vmem %s1992_s25, 256  ;;  %p1994_p9 = scmp.lt.s32.totalorder %s408_s21, %s1992_s25 }
  0xbf   : > { %p1989_p13 = pnand %p1987_p6, %p1943_p1  ;;  %p1995_p2 = scmp.lt.s32.totalorder %s1993_s23, %s1986_s3 }
  0xc1   : > { %p1990_p4 = pneg %p1989_p13  ;;  %p1996_p0 = por %p1995_p2, %p1994_p9 }
  0xc3   : > { %p1997_p7 = pnand %p1996_p0, %p1990_p4 }
  0xc5   : > { %2000 = shalt.err (!%p1997_p7)
}
  0xc6   : > { %1745 = dma.hbm_to_vmem [thread:$0]  (!%p2373_p10), %s2382_s27, 128, %s408_s21, %s397_s22  }
  0xc7   : > { %p2641_p11 = scmp.ne.s32.totalorder %s2627_s20, 0 }
  0xc8   : > { %s2433_s4 = sand.u32 (!%p2641_p11), 1, %s2083_s14   ;;  %p2642_p2 = scmp.ne.s32.totalorder (!%p2641_p11), %s2637_s30, 0 }
  0xc9   : > { %422 = sbr.rel (%p2641_p11) target bundleno = 2095 (0x82f), region = 60  ;;  %s2436_s5 = sshll.u32 (!%p2641_p11), %s2433_s4, 3 }
  0xca   : > { %s425_s10 = scalar_lea.sflag (!%p2641_p11), [#allocation3], %s2433_s4  ;;  %s428_s7 = scalar_lea.vmem (!%p2641_p11), [#allocation2], %s2436_s5 }
  0xd0   : > { %2054 = dma.done.wait (%p2642_p2), %s425_s10, 128  }
  0xd1   : > { %2056 = vsyncadd (%p2642_p2), %s425_s10, 4294967168  ;;  %s433_s20 = sand.u32 1, %s2201_s19   ;;  %s437_s27 = scalar_lea.vmem [#allocation5], %s2436_s5 }
  0xd2   : > { %s434_s8 = scalar_lea.sflag [#allocation6], %s433_s20 }
  0xd3   : > { %2058 = dma.done.wait (%p2642_p2), %s434_s8, 128  }
  0xd4   : > { %2060 = vsyncadd (%p2642_p2), %s434_s8, 4294967168  ;;  %p2643_p10 = scmp.eq.s32.totalorder %s2201_s19, 0 }
  0xd6   : > { %2062 = dma.done.wait (%p2643_p10), [#allocation6], 2048   ;;  %p2644_p1 = pmov %p2643_p10 }
  0xd8   : > { %2064 = vsyncadd (%p2644_p1), [#allocation6], 4294965248  ;;  %p2645_p5 = pmov %p2644_p1 }
  0xd9   : > { %p2646_p8 = pmov %p2644_p1 }
  0xda   : > { %2066 = dma.done.wait (%p2645_p5), [#allocation9], 4096  }
  0xdb   : > { %2068 = vsyncadd (%p2646_p8), [#allocation9], 4294963200  ;;  %p2647_p3 = pmov %p2644_p1 }
  0xdc   : > { %p2648_p12 = pmov %p2644_p1 }
  0xdd   : > { %2070 = dma.done.wait (%p2647_p3), [#allocation12], 2048  }
  0xde   : > { %2072 = vsyncadd (%p2648_p12), [#allocation12], 4294965248  ;;  %v2109_v0 = vmov 0.0|0.0   ;;  %vm2110_vm0 = vmmov 0   ;;  %v2111_v1 = vmov 0.0   ;;  %v594_v2 = vld [vmem:[#allocation8] sm:$0xff] }
  0xdf   : > { %1650 = vmatprep.subr.bf16.mxu1 %v2109_v0  ;;  %1626 = vmatprep.subr.bf16.mxu0 %v2109_v0  ;;  %v595_v3 = vld [vmem:[#allocation8 + $0x8] sm:$0xff]  ;;  %v507_v4 = vld [vmem:[#allocation7] sm:$0xff]  ;;  %v596_v7 = vld [vmem:[#allocation8 + $0x10] sm:$0xff]  ;;  %vm772_vm1 = vcmask 130048   ;;  %s2112_s19 = smov 112   ;;  %p498_p6 = scmp.lt.s32.totalorder %s2091_s16, 1 }
  0xe0   : > { %1557 = vmatprep.mubr.msk.f32.mxu1 %vm2110_vm0, %v2111_v1  ;;  %1522 = vmatprep.mubr.msk.f32.mxu0 %vm2110_vm0, %v2111_v1  ;;  %v1651_v5 = vpack.c.bf16 %v595_v3, %v594_v2  ;;  %v508_v6 = vld [vmem:[#allocation7 + $0x8] sm:$0xff]  ;;  %v597_v8 = vld [vmem:[#allocation8 + $0x18] sm:$0xff]  ;;  %v509_v10 = vld [vmem:[#allocation7 + $0x10] sm:$0xff]  ;;  %vm849_vm3 = vcmask 64512   ;;  %s2113_s26 = smov 16   ;;  %vm1116_vm4 = vcmask 261120  }
  0xe1   : > { %v1627_v9 = vpack.c.bf16 %v508_v6, %v507_v4  ;;  %v510_v11 = vld [vmem:[#allocation7 + $0x18] sm:$0xff]  ;;  %v1654_v12 = vpack.c.bf16 %v597_v8, %v596_v7  ;;  %v598_v14 = vld [vmem:[#allocation8 + $0x20] sm:$0xff]  ;;  %v599_v15 = vld [vmem:[#allocation8 + $0x28] sm:$0xff]  ;;  %s499_s30 = scalar_select %p498_p6, %s2091_s16, 1 }
  0xe2   : > { %1652 = vmatpush3.bf16.msra.mxu1 %v1651_v5  ;;  %v1630_v13 = vpack.c.bf16 %v510_v11, %v509_v10  ;;  %v511_v16 = vld [vmem:[#allocation7 + $0x20] sm:$0xff]  ;;  %v512_v17 = vld [vmem:[#allocation7 + $0x28] sm:$0xff]  ;;  %v1657_v18 = vpack.c.bf16 %v599_v15, %v598_v14  ;;  %v600_v20 = vld [vmem:[#allocation8 + $0x30] sm:$0xff]  ;;  %s2649_s3 = sld [smem:[#allocation25_spill]]  ;;  %s2650_s23 = sld [smem:[#allocation26_spill]] }
  0xe3   : > { %1628 = vmatpush3.bf16.msra.mxu0 %v1627_v9  ;;  %1653 = vmatprep.subr.bf16.mxu1 %v2109_v0  ;;  %v1633_v19 = vpack.c.bf16 %v512_v17, %v511_v16  ;;  %v601_v21 = vld [vmem:[#allocation8 + $0x38] sm:$0xff]  ;;  %v513_v22 = vld [vmem:[#allocation7 + $0x30] sm:$0xff]  ;;  %v602_v26 = vld [vmem:[#allocation8 + $0x40] sm:$0xff]  ;;  %s500_s24 = scalar_lea.vmem %s2604_s2, %s499_s30  ;;  %s2651_s20 = sld [smem:[#allocation27_spill]] }
  0xe4   : > { %1629 = vmatprep.subr.bf16.mxu0 %v2109_v0  ;;  %v514_v23 = vld [vmem:[#allocation7 + $0x38] sm:$0xff]  ;;  %v1660_v24 = vpack.c.bf16 %v601_v21, %v600_v20  ;;  %v603_v27 = vld [vmem:[#allocation8 + $0x48] sm:$0xff]  ;;  %v515_v28 = vld [vmem:[#allocation7 + $0x40] sm:$0xff]  ;;  %s1423_s8 = sshll.u32 %s2091_s16, 7  ;;  %s2652_s22 = sld [smem:[#allocation28_spill]] }
  0xe5   : > { %v1636_v25 = vpack.c.bf16 %v514_v23, %v513_v22  ;;  %v516_v29 = vld [vmem:[#allocation7 + $0x48] sm:$0xff]  ;;  %v1663_v30 = vpack.c.bf16 %v603_v27, %v602_v26  ;;  %v604_v32 = vld [vmem:[#allocation8 + $0x50] sm:$0xff]  ;;  %v605_v33 = vld [vmem:[#allocation8 + $0x58] sm:$0xff]  ;;  %p2653_p4 = scmp.ne.s32.totalorder %s2638_s9, 0  ;;  %s2114_s16 = smov [#allocation13]  }
  0xe6   : > { %1655 = vmatpush3.bf16.msra.mxu1 %v1654_v12  ;;  %v1639_v31 = vpack.c.bf16 %v516_v29, %v515_v28  ;;  %v517_v34 = vld [vmem:[#allocation7 + $0x50] sm:$0xff]  ;;  %v518_v35 = vld [vmem:[#allocation7 + $0x58] sm:$0xff]  ;;  %v1666_v36 = vpack.c.bf16 %v605_v33, %v604_v32  ;;  %v606_v38 = vld [vmem:[#allocation8 + $0x60] sm:$0xff] }
  0xe7   : > { %1631 = vmatpush3.bf16.msra.mxu0 %v1630_v13  ;;  %1656 = vmatprep.subr.bf16.mxu1 %v2109_v0  ;;  %v1642_v37 = vpack.c.bf16 %v518_v35, %v517_v34  ;;  %v607_v39 = vld [vmem:[#allocation8 + $0x68] sm:$0xff]  ;;  %v519_v40 = vld [vmem:[#allocation7 + $0x60] sm:$0xff]  ;;  %v608_v44 = vld [vmem:[#allocation8 + $0x70] sm:$0xff] }
  0xe8   : > { %1632 = vmatprep.subr.bf16.mxu0 %v2109_v0  ;;  %v520_v41 = vld [vmem:[#allocation7 + $0x68] sm:$0xff]  ;;  %v1669_v42 = vpack.c.bf16 %v607_v39, %v606_v38  ;;  %v609_v45 = vld [vmem:[#allocation8 + $0x78] sm:$0xff]  ;;  %v521_v46 = vld [vmem:[#allocation7 + $0x70] sm:$0xff] }
  0xe9   : > { %v1645_v43 = vpack.c.bf16 %v520_v41, %v519_v40  ;;  %v522_v47 = vld [vmem:[#allocation7 + $0x78] sm:$0xff]  ;;  %v1672_v48 = vpack.c.bf16 %v609_v45, %v608_v44  ;;  %v2486_v51 = vld [vmem:[%s428_s7] sm:$0xff]  ;;  %v682_v54 = vld [vmem:[#allocation10 + $0x10] sm:$0xff] }
  0xea   : > { %1658 = vmatpush3.bf16.msra.mxu1 %v1657_v18  ;;  %v1648_v49 = vpack.c.bf16 %v522_v47, %v521_v46  ;;  %v503_v50 = vld [vmem:[%s437_s27] sm:$0xff]  ;;  %v680_v52 = vld [vmem:[#allocation10] sm:$0xff]  ;;  %v681_v53 = vld [vmem:[#allocation10 + $0x8] sm:$0xff]  ;;  %s497_s27 = scalar_lea.vmem [#allocation13], %s2436_s5  ;;  %s2005_s5 = sshll.u32 %s2114_s16, 4  ;;  %s2006_s5 = int_to_ptr.vmem [resolvable:$false] %s2005_s5 }
  0xeb   : > { %1634 = vmatpush3.bf16.msra.mxu0 %v1633_v19  ;;  %1659 = vmatprep.subr.bf16.mxu1 %v2109_v0  ;;  %v1675_v55 = vpack.c.bf16 %v681_v53, %v680_v52  ;;  %v683_v56 = vld [vmem:[#allocation10 + $0x18] sm:$0xff]  ;;  %v684_v58 = vld [vmem:[#allocation10 + $0x20] sm:$0xff]  ;;  %v685_v59 = vld [vmem:[#allocation10 + $0x28] sm:$0xff]  ;;  %v767_v19 = vlaneseq  ;;  %s2007_s6 = scalar_lea.vmem %s2006_s5, 256 }
  0xec   : > { %1635 = vmatprep.subr.bf16.mxu0 %v2109_v0  ;;  %v1678_v57 = vpack.c.bf16 %v683_v56, %v682_v54  ;;  %v1681_v60 = vpack.c.bf16 %v685_v59, %v684_v58  ;;  %v686_v61 = vld [vmem:[#allocation10 + $0x30] sm:$0xff]  ;;  %v687_v62 = vld [vmem:[#allocation10 + $0x38] sm:$0xff]  ;;  %v688_v7 = vld [vmem:[#allocation10 + $0x40] sm:$0xff] }
  0xed   : > { %v1684_v4 = vpack.c.bf16 %v687_v62, %v686_v61  ;;  %v689_v8 = vld [vmem:[#allocation10 + $0x48] sm:$0xff]  ;;  %v690_v10 = vld [vmem:[#allocation10 + $0x50] sm:$0xff]  ;;  %v691_v11 = vld [vmem:[#allocation10 + $0x58] sm:$0xff]  ;;  %v768_v21 = vshrl.u32 %v767_v19, 7 }
  0xee   : > { %1661 = vmatpush3.bf16.msra.mxu1 %v1660_v24  ;;  %v1687_v9 = vpack.c.bf16 %v689_v8, %v688_v7  ;;  %v1690_v12 = vpack.c.bf16 %v691_v11, %v690_v10  ;;  %v692_v13 = vld [vmem:[#allocation10 + $0x60] sm:$0xff]  ;;  %v693_v14 = vld [vmem:[#allocation10 + $0x68] sm:$0xff]  ;;  %v694_v16 = vld [vmem:[#allocation10 + $0x70] sm:$0xff] }
  0xef   : > { %1637 = vmatpush3.bf16.msra.mxu0 %v1636_v25  ;;  %1662 = vmatprep.subr.bf16.mxu1 %v2109_v0  ;;  %v1693_v15 = vpack.c.bf16 %v693_v14, %v692_v13  ;;  %v695_v17 = vld [vmem:[#allocation10 + $0x78] sm:$0xff]  ;;  %v504_v20 = vld [vmem:[%s500_s24] sm:$0x1]  ;;  %v769_v22 = vsub.s32 0, %v768_v21  ;;  %v1106_v52 = vld [vmem:[#allocation11 + $0x8] sm:$0xff]  ;;  %s2553_s24 = scalar_lea.hbm %s2652_s22, %s1423_s8 }
  0xf0   : > { %1638 = vmatprep.subr.bf16.mxu0 %v2109_v0  ;;  %v1696_v18 = vpack.c.bf16 %v695_v17, %v694_v16  ;;  %vm505_vm2 = vcmp.eq.s32.totalorder %v504_v20, 0  ;;  %v1107_v53 = vld [vmem:[#allocation11 + $0x10] sm:$0xff]  ;;  %v1421_v21 = vld [vmem:[%s2651_s20] ss:$0 sm:$0xff] }
  0xf1   : > { %v506_v23 = vsel %vm505_vm2, -inf, %v2111_v1 }
  0xf2   : > { %1664 = vmatpush3.bf16.msra.mxu1 %v1663_v30  ;;  %v770_v24 = vrot.slane %v506_v23, %v769_v22 }
  0xf3   : > { %1640 = vmatpush3.bf16.msra.mxu0 %v1639_v31  ;;  %1665 = vmatprep.subr.bf16.mxu1 %v2109_v0 }
  0xf4   : > { %1641 = vmatprep.subr.bf16.mxu0 %v2109_v0 }
  0xf6   : > { %1667 = vmatpush3.bf16.msra.mxu1 %v1666_v36 }
  0xf7   : > { %1643 = vmatpush3.bf16.msra.mxu0 %v1642_v37  ;;  %1668 = vmatprep.subr.bf16.mxu1 %v2109_v0 }
  0xf8   : > { %1644 = vmatprep.subr.bf16.mxu0 %v2109_v0 }
  0xfa   : > { %1670 = vmatpush3.bf16.msra.mxu1 %v1669_v42 }
  0xfb   : > { %1646 = vmatpush3.bf16.msra.mxu0 %v1645_v43  ;;  %1671 = vmatprep.subr.bf16.mxu1 %v2109_v0 }
  0xfc   : > { %1647 = vmatprep.subr.bf16.mxu0 %v2109_v0 }
  0xfe   : > { %1673 = vmatpush3.bf16.msra.mxu1 %v1672_v48 }
  0xff   : > { %1649 = vmatpush3.bf16.msra.mxu0 %v1648_v49  ;;  %1595 = vmatprep.subr.mxu1 %v2111_v1 }
 0x100   : > { %1674 = vmatprep.subr.bf16.mxu0 %v2109_v0 }
 0x101   : > { %1558 = vmatmul.mubr.f32.vlgmr.msra.gmra.mrb[0].mxu1 %v503_v50 }
 0x102   : > { %1523 = vmatmul.mubr.f32.vlgmr.msra.gmra.mrb[0].mxu0 %v2486_v51  ;;  %1597 = vmatprep.mubr.msk.f32.mxu1 %vm2110_vm0, %v2111_v1 }
 0x103   : > { %1592 = vmatprep.mubr.msk.f32.mxu0 %vm2110_vm0, %v2111_v1  ;;  %1676 = vmatpush3.bf16.msra.mxu0 %v1675_v55  ;;  %v1108_v55 = vld [vmem:[#allocation11 + $0x18] sm:$0xff] }
 0x104   : > { %1677 = vmatprep.subr.bf16.mxu0 %v2109_v0  ;;  %v1702_v56 = vpack.c.bf16 %v1108_v55, %v1107_v53 }
 0x107   : > { %1679 = vmatpush3.bf16.msra.mxu0 %v1678_v57 }
 0x108   : > { %1680 = vmatprep.subr.bf16.mxu0 %v2109_v0 }
 0x10b   : > { %1682 = vmatpush3.bf16.msra.mxu0 %v1681_v60 }
 0x10c   : > { %1683 = vmatprep.subr.bf16.mxu0 %v2109_v0 }
 0x10f   : > { %1685 = vmatpush3.bf16.msra.mxu0 %v1684_v4 }
 0x110   : > { %1686 = vmatprep.subr.bf16.mxu0 %v2109_v0 }
 0x113   : > { %1688 = vmatpush3.bf16.msra.mxu0 %v1687_v9 }
 0x114   : > { %1689 = vmatprep.subr.bf16.mxu0 %v2109_v0 }
 0x117   : > { %1691 = vmatpush3.bf16.msra.mxu0 %v1690_v12 }
 0x118   : > { %1692 = vmatprep.subr.bf16.mxu0 %v2109_v0 }
 0x11b   : > { %1694 = vmatpush3.bf16.msra.mxu0 %v1693_v15 }
 0x11c   : > { %1695 = vmatprep.subr.bf16.mxu0 %v2109_v0 }
 0x11f   : > { %1697 = vmatpush3.bf16.msra.mxu0 %v1696_v18 }
 0x122   : > { %1593 = vmatmul.mubr.f32.vlgmr.msra.gmra.mrb[2].mxu0 %v503_v50  ;;  %v1105_v50 = vld [vmem:[#allocation11] sm:$0xff] }
 0x123   : > { %v1699_v54 = vpack.c.bf16 %v1106_v52, %v1105_v50 }
 0x1d4   : > { %v676_v63 = vpop.f32.mrb[0].mxu1 }
 0x1d5   : > { %v589_v2 = vpop.f32.mrb[0].mxu0  ;;  %v1559_v3 = vpop.f32.mrb[1].mxu1  ;;  %1596 = vmatpush3.xpose.msk.msra.mxu1 %vm772_vm1, %v676_v63 }
 0x1d6   : > { %v593_v5 = vmul.f32 0.17677669, %v589_v2  ;;  %v1524_v6 = vpop.f32.mrb[1].mxu0  ;;  %1600 = vmatprep.subr.mxu1 %v2111_v1 }
 0x1d8   : > { %1598 = vmatmul.mubr.msk.f32.vlgmr.msra.gmra.mrb[2].mxu1 %vm772_vm1, %v593_v5  ;;  %934 = vrot.lane.b32.xlu1 %v593_v5, %s2112_s19  ;;  %v1417_v5 = vld [vmem:[%s2649_s3] ss:$0 sm:$0xff] }
 0x1d9   : > { %1602 = vmatprep.mubr.msk.f32.mxu1 %vm2110_vm0, %v2111_v1 }
 0x1f5   : > { %v762_v29 = vpop.f32.mrb[2].mxu0 }
 0x1f6   : > { %v1594_v30 = vpop.f32.mrb[3].mxu0  ;;  %1601 = vmatpush3.msra.mxu1 %v762_v29 }
 0x1f7   : > { %1605 = vmatprep.subr.mxu1 %v2111_v1 }
 0x24a   : > { %v935_v37 = vpop.permute.xlu1 %934 }
 0x2ab   : > { %v845_v25 = vpop.f32.mrb[2].mxu1 }
 0x2ac   : > { %v846_v26 = vadd.f32 %v845_v25, %v770_v24  ;;  %v1599_v27 = vpop.f32.mrb[3].mxu1 }
 0x2ae   : > { %v850_v28 = vsel %vm849_vm3, %v846_v26, -inf }
 0x2af   : > { %851 = vmax.xlane.f32.xlu0 %v850_v28 }
 0x2c5   : > { %936 = vrot.lane.b32.xlu0 %v676_v63, %s2112_s19 }
 0x2c9   : > { %1022 = vrot.lane.b32.xlu0 %v762_v29, %s2112_s19  ;;  %s1241_s19 = sshll.u32 %s497_s27, 4  ;;  %s2555_s19 = int_to_ptr.vmem [resolvable:$true] %s1241_s19 }
 0x2ca   : > { %s2001_s29 = scalar_lea.vmem %s2555_s19, 128  ;;  %p2008_p7 = scmp.lt.s32.totalorder %s2555_s19, %s2006_s5 }
 0x2cb   : > { %p2002_p13 = scmp.ne.s32.totalorder %s2555_s19, %s2001_s29  ;;  %p2009_p11 = scmp.lt.s32.totalorder %s2007_s6, %s2001_s29 }
 0x2cd   : > { %p2003_p9 = pnand %p2002_p13, %p2653_p4  ;;  %p2010_p2 = por %p2009_p11, %p2008_p7 }
 0x2cf   : > { %p2004_p0 = pneg %p2003_p9 }
 0x2d1   : > { %p2011_p10 = pnand %p2010_p2, %p2004_p0 }
 0x33c   : > { %v852_v31 = vpop.xlane.xlu0 %851 }
 0x33d   : > { %v853_v32 = vsub.f32 %v846_v26, %v852_v31 }
 0x33f   : > { %v854_v33 = vmul.f32 1.442695, %v853_v32 }
 0x340   : > { %v937_v34 = vpop.permute.xlu0 %936 }
 0x341   : > { %1819 = vpow2.f32 %v854_v33 }
 0x344   : > { %v1023_v36 = vpop.permute.xlu0 %1022 }
 0x34b   : > { %v1820_v35 = vpop.eup %1819 }
 0x34c   : > { %1603 = vmatmul.mubr.msk.f32.vlgmr.msra.gmra.mrb[4].mxu1 %vm849_vm3, %v1820_v35  ;;  %v856_v44 = vsel %vm849_vm3, %v1820_v35, 0.0 }
 0x34d   : > { %1606 = vmatpush3.xpose.msk.msra.mxu1 %vm772_vm1, %v937_v34  ;;  %1607 = vmatprep.mubr.msk.f32.mxu1 %vm2110_vm0, %v2111_v1 }
 0x34e   : > { %1610 = vmatprep.subr.mxu1 %v2111_v1 }
 0x350   : > { %1608 = vmatmul.mubr.msk.f32.vlgmr.msra.gmra.mrb[6].mxu1 %vm772_vm1, %v935_v37 }
 0x351   : > { %1611 = vmatpush3.msra.mxu1 %v1023_v36  ;;  %1612 = vmatprep.mubr.msk.f32.mxu1 %vm2110_vm0, %v2111_v1 }
 0x352   : > { %1698 = vmatprep.subr.bf16.mxu1 %v2109_v0 }
 0x41f   : > { %v928_v38 = vpop.f32.mrb[4].mxu1 }
 0x420   : > { %v1604_v39 = vpop.f32.mrb[5].mxu1 }
 0x423   : > { %v1008_v40 = vpop.f32.mrb[6].mxu1 }
 0x424   : > { %v1009_v41 = vadd.f32 %v1008_v40, %v770_v24  ;;  %v1609_v42 = vpop.f32.mrb[7].mxu1 }
 0x426   : > { %v1012_v43 = vsel %vm849_vm3, %v1009_v41, -inf }
 0x427   : > { %1013 = vmax.xlane.f32.xlu1 %v1012_v43 }
 0x42b   : > { %857 = vadd.xlane.f32.xlu1 %v856_v44 }
 0x4b4   : > { %v1014_v45 = vpop.xlane.xlu1 %1013 }
 0x4b5   : > { %v1015_v46 = vsub.f32 %v1009_v41, %v1014_v45 }
 0x4b7   : > { %v1016_v47 = vmul.f32 1.442695, %v1015_v46 }
 0x4b8   : > { %v858_v62 = vpop.xlane.xlu1 %857 }
 0x4b9   : > { %1821 = vpow2.f32 %v1016_v47 }
 0x4c3   : > { %v1822_v48 = vpop.eup %1821 }
 0x4c4   : > { %1613 = vmatmul.mubr.msk.f32.vlgmr.msra.gmra.mrb[8].mxu1 %vm849_vm3, %v1822_v48  ;;  %v1018_v49 = vsel %vm849_vm3, %v1822_v48, 0.0 }
 0x4c5   : > { %1019 = vadd.xlane.f32.xlu0 %v1018_v49  ;;  %1623 = vmatprep.mubr.msk.f32.mxu1 %vm2110_vm0, %v2111_v1 }
 0x4c6   : > { %1700 = vmatpush3.bf16.msra.mxu1 %v1699_v54 }
 0x4c7   : > { %1701 = vmatprep.subr.bf16.mxu1 %v2109_v0  ;;  %v1192_v0 = vand.u32 127, %v767_v19 }
 0x4c9   : > { %vm1193_vm5 = vcmp.lt.s32.totalorder %v1192_v0, 32 }
 0x4ca   : > { %1703 = vmatpush3.bf16.msra.mxu1 %v1702_v56  ;;  %v1419_v9 = vsel %vm1193_vm5, 1.0, %v2111_v1  ;;  %v1420_v1 = vld [vmem:[%s2650_s23] ss:$0 sm:$0xff] }
 0x552   : > { %v1020_v57 = vpop.xlane.xlu0 %1019 }
 0x553   : > { %1823 = vrcp.f32 %v1020_v57 }
 0x554   : > { %1825 = vrcp.f32 %v858_v62 }
 0x55d   : > { %v1824_v58 = vpop.eup %1823 }
 0x55e   : > { %v1826_v63 = vpop.eup %1825 }
 0x55f   : > { %v933_v2 = vmul.f32 %v1826_v63, %v928_v38 }
 0x597   : > { %v1094_v59 = vpop.f32.mrb[8].mxu1 }
 0x598   : > { %v1099_v60 = vmul.f32 %v1824_v58, %v1094_v59  ;;  %v1614_v61 = vpop.f32.mrb[9].mxu1 }
 0x59a   : > { %1101 = vrot.lane.b32.xlu1 %v1099_v60, %s2113_s26  ;;  %s1227_s26 = scalar_lea.sflag [#allocation4], %s2433_s4 }
 0x60c   : > { %v1102_v3 = vpop.permute.xlu1 %1101 }
 0x60d   : > { %v1104_v4 = vsel %vm772_vm1, %v933_v2, %v1102_v3 }
 0x60e   : > { %1624 = vmatmul.mubr.msk.f32.vlgmr.msra.gmra.mrb[10].mxu1 %vm1116_vm4, %v1104_v4 }
 0x6e1   : > { %v1186_v6 = vpop.f32.mrb[10].mxu1 }
 0x6e2   : > { %v1187_v7 = vadd.f32 %v1417_v5, %v1186_v6  ;;  %v1625_v8 = vpop.f32.mrb[11].mxu1 }
 0x6e4   : > { %v1190_v10 = vadd.f32 %v1187_v7, %v2486_v51 }
 0x6e6   : > { %v1196_v11 = vmul.f32 %v1419_v9, %v1190_v10 }
 0x6e8   : > { %1197 = vadd.xlane.f32.xlu0 %v1196_v11 }
 0x775   : > { %v1198_v12 = vpop.xlane.xlu0 %1197 }
 0x776   : > { %v1199_v13 = vmul.f32 0.03125, %v1198_v12 }
 0x778   : > { %v1200_v14 = vsub.f32 %v1190_v10, %v1199_v13 }
 0x77a   : > { %v1201_v15 = vmul.f32 %v1419_v9, %v1200_v14 }
 0x77c   : > { %v1202_v16 = vmul.f32 %v1201_v15, %v1201_v15 }
 0x77e   : > { %1203 = vadd.xlane.f32.xlu1 %v1202_v16 }
 0x80b   : > { %v1204_v17 = vpop.xlane.xlu1 %1203 }
 0x80c   : > { %v1205_v18 = vmul.f32 0.03125, %v1204_v17 }
 0x80e   : > { %v1206_v19 = vadd.f32 1e-12, %v1205_v18 }
 0x810   : > { %1827 = vrsqrt.f32 %v1206_v19 }
 0x81a   : > { %v1828_v20 = vpop.eup %1827 }
 0x81b   : > { %v1208_v51 = vmul.f32 %v1828_v20, %v1201_v15 }
 0x81d   : > { %v1216_v22 = vmul.f32 %v1420_v1, %v1208_v51 }
 0x81f   : > { %v1224_v23 = vadd.f32 %v1421_v21, %v1216_v22 }
 0x821   : > { %1225 = vst [vmem:[%s497_s27] sm:$0xff] %v1224_v23 }
 0x822   : > { %2014 = shalt.err (!%p2011_p10)
}
 0x823   : > { %s2015_s4 = scalar_lea.hbm %s2553_s24, 128  ;;  %s2019_s25 = scalar_lea.hbm %s2652_s22, 256 }
 0x824   : > { %p2016_p1 = scmp.ne.s32.totalorder %s2553_s24, %s2015_s4  ;;  %p2020_p3 = scmp.lt.u32.totalorder %s2553_s24, %s2652_s22 }
 0x825   : > { %p2021_p12 = scmp.lt.u32.totalorder %s2019_s25, %s2015_s4  ;;  %p2023_p13 = scmp.lt.u32.totalorder %s2015_s4, %s2553_s24 }
 0x826   : > { %p2017_p5 = pnand %p2016_p1, %p2653_p4 }
 0x827   : > { %p2022_p6 = por %p2021_p12, %p2020_p3 }
 0x828   : > { %p2018_p8 = pneg %p2017_p5 }
 0x829   : > { %p2024_p9 = por %p2023_p13, %p2022_p6 }
 0x82b   : > { %p2025_p0 = pnand %p2024_p9, %p2018_p8 }
 0x82d   : > { %2028 = shalt.err (!%p2025_p0)
}
 0x82e   : > { %1724 = dma.vmem_to_hbm [thread:$0]  (%p2653_p4), %s2555_s19, 128, %s2553_s24, %s1227_s26  }
 0x82f PF: > { %s1253_s7 = sand.u32 1, %s2079_s13   ;;  %p2654_p7 = scmp.ne.s32.totalorder %s2639_s12, 0 }
 0x830   : > { %p2655_p11 = scmp.ge.s32.totalorder %s2099_s18, 2  ;;  %s1254_s20 = scalar_lea.sflag [#allocation4], %s1253_s7 }
 0x832   : > { %p1747_p2 = pnand %p2655_p11, %p2654_p7 }
 0x834   : > { %2074 = dma.done.wait (!%p1747_p2), %s1254_s20, 128  }
 0x835   : > { %2076 = vsyncadd (!%p1747_p2), %s1254_s20, 4294967168  ;;  %s31_s18 = sadd.s32 1, %s2099_s18   ;;  %s2656_s9 = sld [smem:[#allocation20_spill]] }
 0x836   : > { %p28_p10 = scmp.ge.s32.totalorder %s31_s18, 4   ;;  %s2657_s13 = smov %s2083_s14 }
 0x837   : > { %s2658_s14 = smov %s2087_s15  ;;  %s2659_s15 = smov %s2354_s11 }
 0x838   : > { %s2660_s16 = smov %s2095_s17  ;;  %30 = sbr.rel (!%p28_p10) target bundleno = 19 (0x13), region = 137 }
 0x83b   : > { %s2661_s17 = smov %s2656_s9 }
 0x83f   :  { %1259 = vsyncpa [#allocation3], 1 }
 0x840   :  { %1261 = vsyncpa [#allocation3 + $0x1], 1 }
 0x841   :  { %1262 = vsyncpa [#allocation6], 1 }
 0x842   :  { %1264 = vsyncpa [#allocation6 + $0x1], 1 }
 0x843   :  { %1265 = vsyncpa [#allocation9], 1 }
 0x844   :  { %1266 = vsyncpa [#allocation12], 1 }
 0x845   :  { %1267 = vsyncpa [#allocation4], 1 }
 0x846   :  { %1269 = vsyncpa [#allocation4 + $0x1], 1 }

</bundles_post_ra>
